<compile_context>
chip_gen: v7x
topology: tpu7x:2x2x1
jax: 0.10.0
libtpu: 0.0.40
codegen_flags: <defaults>
</compile_context>

<pallas_src>
import functools

import jax
import jax.numpy as jnp
from jax.experimental import pallas as pl
from jax.experimental.pallas import tpu as pltpu

HIDDEN = 256


def _default_tanh_dtype():
    """bf16 tanh on v6e/v7x (EUP has bf16); f32 tanh on v5e (EUP has no bf16)."""
    try:
        kind = jax.devices()[0].device_kind.lower()
        if "v5 lite" in kind or "v5lite" in kind or "v5e" in kind:
            return jnp.float32
    except Exception:
        pass
    return jnp.bfloat16


def _barrier_net_kernel(x_ref, w1_ref, b1_ref, w2_ref, b2_ref, w3_ref, b3_ref,
                        o_ref, *, tanh_dtype):
    # Layer 1: Linear(in, 256) + Tanh. bf16 MXU matmul, f32 accumulate.
    x = x_ref[...]
    if x.dtype != jnp.bfloat16:
        x = x.astype(jnp.bfloat16)
    z1 = jnp.dot(x, w1_ref[...], preferred_element_type=jnp.float32) + b1_ref[...]
    h1 = jnp.tanh(z1.astype(tanh_dtype)).astype(jnp.bfloat16)

    # Layer 2: Linear(256, 256) + Tanh.
    z2 = jnp.dot(h1, w2_ref[...], preferred_element_type=jnp.float32) + b2_ref[...]
    h2 = jnp.tanh(z2.astype(tanh_dtype)).astype(jnp.float32)

    # Layer 3: Linear(256, 1) as VPU multiply + XLU row reduction (no MXU work,
    # width-1 output store — no inflated HBM writeback).
    w3_row = w3_ref[...].astype(jnp.float32)                # (1, hidden)
    y = (h2 * w3_row).sum(axis=-1, keepdims=True) + b3_ref[...]
    o_ref[...] = y.astype(o_ref.dtype)


def barrier_net_forward(x, w1, b1, w2, b2, w3_row, b3, *,
                        block_b=1024, tanh_dtype=None):
    """x: (B, input_dims). w1/w2: (in, out) bf16; w3_row: (1, 256) f32;
    biases: (1, out) f32 (b3: (1, 1)). Returns (B, 1) f32."""
    B, in_dims = x.shape
    hidden = w1.shape[1]
    if tanh_dtype is None:
        tanh_dtype = _default_tanh_dtype()

    # Batch tile: multiple of 8 sublanes, capped at block_b rows per grid step.
    tb = min(block_b, pl.cdiv(B, 8) * 8)
    padded_b = pl.cdiv(B, tb) * tb
    if padded_b != B:
        x = jnp.pad(x, ((0, padded_b - B), (0, 0)))

    grid = (padded_b // tb,)
    # Weights / biases: same block every grid step -> stay VMEM-resident.
    resident = lambda a: pl.BlockSpec(a.shape, lambda i: (0,) * a.ndim)

    x_bytes = x.dtype.itemsize
    flops = 2 * padded_b * (in_dims * hidden + hidden * hidden + hidden)
    bytes_accessed = (
        padded_b * in_dims * x_bytes                      # x
        + (in_dims * hidden + hidden * hidden) * 2        # bf16 weights
        + hidden * 4                                      # w3 row (f32)
        + (2 * hidden + 1) * 4                            # f32 biases
        + padded_b * 4                                    # (B, 1) f32 output
    )

    kernel = functools.partial(_barrier_net_kernel, tanh_dtype=tanh_dtype)

    out = pl.pallas_call(
        kernel,
        out_shape=jax.ShapeDtypeStruct((padded_b, 1), jnp.float32),
        grid=grid,
        in_specs=[
            pl.BlockSpec((tb, in_dims), lambda i: (i, 0)),  # x: pipelined over batch
            resident(w1), resident(b1),
            resident(w2), resident(b2),
            resident(w3_row), resident(b3),
        ],
        out_specs=pl.BlockSpec((tb, 1), lambda i: (i, 0)),
        compiler_params=pltpu.CompilerParams(
            # TODO(synk): verify in an xprof trace that "parallel" actually
            # shards the batch grid across both v7x TensorCores; if not, switch
            # to pltpu.CORE_PARALLEL / an explicit core-split grid axis.
            dimension_semantics=("parallel",),
        ),
        cost_estimate=pl.CostEstimate(
            flops=flops,
            transcendentals=2 * padded_b * hidden,  # two tanh layers
            bytes_accessed=bytes_accessed,
        ),
    )(x, w1, b1, w2, b2, w3_row, b3)

    return out[:B]


def init_params(key, input_dims, hidden=HIDDEN):
    # PyTorch-style uniform fan-in init. w1/w2 stored pre-transposed (in, out)
    # in bf16 (halves weight HBM traffic; f32 accumulate in-kernel). The final
    # layer is stored once as a (1, hidden) f32 row (no per-call reshape/pad).
    ks = jax.random.split(key, 6)

    def linear(kw, kb, fan_in, fan_out):
        bound = 1.0 / jnp.sqrt(fan_in)
        w = jax.random.uniform(kw, (fan_in, fan_out), jnp.float32, -bound, bound)
        b = jax.random.uniform(kb, (1, fan_out), jnp.float32, -bound, bound)
        return w, b

    w1, b1 = linear(ks[0], ks[1], input_dims, hidden)
    w2, b2 = linear(ks[2], ks[3], hidden, hidden)
    w3, b3 = linear(ks[4], ks[5], hidden, 1)
    w3_row = jnp.transpose(w3)  # (1, hidden) f32, kept f32 for the VPU reduce
    return (w1.astype(jnp.bfloat16), b1,
            w2.astype(jnp.bfloat16), b2,
            w3_row, b3)


def reference_forward(x, w1, b1, w2, b2, w3_row, b3, tanh_dtype=None):
    # Mirrors the kernel math: bf16 matmul inputs, f32 accumulate, matching
    # tanh dtype, f32 multiply+reduce final layer.
    if tanh_dtype is None:
        tanh_dtype = _default_tanh_dtype()
    z1 = jnp.dot(x.astype(jnp.bfloat16), w1,
                 preferred_element_type=jnp.float32) + b1
    h1 = jnp.tanh(z1.astype(tanh_dtype)).astype(jnp.bfloat16)
    z2 = jnp.dot(h1, w2, preferred_element_type=jnp.float32) + b2
    h2 = jnp.tanh(z2.astype(tanh_dtype)).astype(jnp.float32)
    return (h2 * w3_row.astype(jnp.float32)).sum(-1, keepdims=True) + b3


if __name__ == "__main__":
    key = jax.random.PRNGKey(0)
    k_x, k_p = jax.random.split(key)

    batch, input_dims = 8, 32
    x = jax.random.normal(k_x, (batch, input_dims), jnp.float32)
    params = init_params(k_p, input_dims)

    out = barrier_net_forward(x, *params)
    out = jax.block_until_ready(out)

    ref = reference_forward(x, *params)
    assert out.shape == (batch, 1)
    assert jnp.allclose(out, ref, atol=1e-2, rtol=1e-2)

    print("KERNEL_OK")
</pallas_src>

<mosaic_0001>
module attributes {stable_mosaic.version = 11 : i64} {
  func.func @_barrier_net_kernel(%arg0: i32, %arg1: memref<8x32xf32, #tpu.memory_space<vmem>>, %arg2: memref<32x256xbf16, #tpu.memory_space<vmem>>, %arg3: memref<1x256xf32, #tpu.memory_space<vmem>>, %arg4: memref<256x256xbf16, #tpu.memory_space<vmem>>, %arg5: memref<1x256xf32, #tpu.memory_space<vmem>>, %arg6: memref<1x256xf32, #tpu.memory_space<vmem>>, %arg7: memref<1x1xf32, #tpu.memory_space<vmem>>, %arg8: memref<8x1xf32, #tpu.memory_space<vmem>>) attributes {dimension_semantics = [#tpu.dimension_semantics<parallel>], iteration_bounds = array<i64: 1>, scalar_prefetch = 0 : i64, scratch_operands = 0 : i64, tpu.core_type = #tpu.core_type<tc>, window_params = [{transform_indices = @transform_0, window_bounds = array<i64: 8, 32>}, {pipeline_mode = #tpu.pipeline_mode<synchronous>, transform_indices = @transform_1, window_bounds = array<i64: 32, 256>}, {pipeline_mode = #tpu.pipeline_mode<synchronous>, transform_indices = @transform_2, window_bounds = array<i64: 1, 256>}, {pipeline_mode = #tpu.pipeline_mode<synchronous>, transform_indices = @transform_3, window_bounds = array<i64: 256, 256>}, {pipeline_mode = #tpu.pipeline_mode<synchronous>, transform_indices = @transform_4, window_bounds = array<i64: 1, 256>}, {pipeline_mode = #tpu.pipeline_mode<synchronous>, transform_indices = @transform_5, window_bounds = array<i64: 1, 256>}, {pipeline_mode = #tpu.pipeline_mode<synchronous>, transform_indices = @transform_6, window_bounds = array<i64: 1, 1>}, {transform_indices = @transform_7, window_bounds = array<i64: 8, 1>}]} {
    %c0 = arith.constant 0 : index
    %c0_0 = arith.constant 0 : index
    %0 = vector.load %arg1[%c0, %c0_0] : memref<8x32xf32, #tpu.memory_space<vmem>>, vector<8x32xf32>
    %1 = arith.truncf %0 : vector<8x32xf32> to vector<8x32xbf16>
    %c0_1 = arith.constant 0 : index
    %c0_2 = arith.constant 0 : index
    %2 = vector.load %arg2[%c0_1, %c0_2] : memref<32x256xbf16, #tpu.memory_space<vmem>>, vector<32x256xbf16>
    %cst = arith.constant dense<0.000000e+00> : vector<8x256xf32>
    %3 = tpu.matmul %1, %2, %cst {dimension_numbers = #tpu.dot_dimension_numbers<[1], [0], [0], [1], [0, 0, 1, 1], [], []>} : vector<8x32xbf16>, vector<32x256xbf16>, vector<8x256xf32> -> vector<8x256xf32>
    %c0_3 = arith.constant 0 : index
    %c0_4 = arith.constant 0 : index
    %4 = vector.load %arg3[%c0_3, %c0_4] : memref<1x256xf32, #tpu.memory_space<vmem>>, vector<1x256xf32>
    %5 = vector.broadcast %4 : vector<1x256xf32> to vector<8x256xf32>
    %6 = arith.addf %3, %5 : vector<8x256xf32>
    %7 = arith.truncf %6 : vector<8x256xf32> to vector<8x256xbf16>
    %8 = math.tanh %7 : vector<8x256xbf16>
    %c0_5 = arith.constant 0 : index
    %c0_6 = arith.constant 0 : index
    %9 = vector.load %arg4[%c0_5, %c0_6] : memref<256x256xbf16, #tpu.memory_space<vmem>>, vector<256x256xbf16>
    %cst_7 = arith.constant dense<0.000000e+00> : vector<8x256xf32>
    %10 = tpu.matmul %8, %9, %cst_7 {dimension_numbers = #tpu.dot_dimension_numbers<[1], [0], [0], [1], [0, 0, 1, 1], [], []>} : vector<8x256xbf16>, vector<256x256xbf16>, vector<8x256xf32> -> vector<8x256xf32>
    %c0_8 = arith.constant 0 : index
    %c0_9 = arith.constant 0 : index
    %11 = vector.load %arg5[%c0_8, %c0_9] : memref<1x256xf32, #tpu.memory_space<vmem>>, vector<1x256xf32>
    %12 = vector.broadcast %11 : vector<1x256xf32> to vector<8x256xf32>
    %13 = arith.addf %10, %12 : vector<8x256xf32>
    %14 = arith.truncf %13 : vector<8x256xf32> to vector<8x256xbf16>
    %15 = math.tanh %14 : vector<8x256xbf16>
    %16 = arith.extf %15 : vector<8x256xbf16> to vector<8x256xf32>
    %c0_10 = arith.constant 0 : index
    %c0_11 = arith.constant 0 : index
    %17 = vector.load %arg6[%c0_10, %c0_11] : memref<1x256xf32, #tpu.memory_space<vmem>>, vector<1x256xf32>
    %18 = vector.broadcast %17 : vector<1x256xf32> to vector<8x256xf32>
    %19 = arith.mulf %16, %18 : vector<8x256xf32>
    %cst_12 = arith.constant dense<0.000000e+00> : vector<8xf32>
    %20 = vector.multi_reduction <add>, %19, %cst_12 [1] : vector<8x256xf32> to vector<8xf32>
    %21 = vector.shape_cast %20 : vector<8xf32> to vector<8x1xf32>
    %c0_13 = arith.constant 0 : index
    %c0_14 = arith.constant 0 : index
    %22 = vector.load %arg7[%c0_13, %c0_14] : memref<1x1xf32, #tpu.memory_space<vmem>>, vector<1x1xf32>
    %23 = vector.broadcast %22 : vector<1x1xf32> to vector<8x1xf32>
    %24 = arith.addf %21, %23 : vector<8x1xf32>
    %c0_15 = arith.constant 0 : index
    %c0_16 = arith.constant 0 : index
    %25 = vector.load %arg8[%c0_15, %c0_16] : memref<8x1xf32, #tpu.memory_space<vmem>>, vector<8x1xf32>
    tpu.vector_store %arg8[%c0_15, %c0_16], %24 {strides = array<i32>} : memref<8x1xf32, #tpu.memory_space<vmem>>, vector<8x1xf32>,
    return
  }
  func.func @transform_0(%arg0: i32) -> (i32, i32) {
    %c0_i32 = arith.constant 0 : i32
    %c0_i32_0 = arith.constant 0 : i32
    return %arg0, %c0_i32 : i32, i32
  }
  func.func @transform_1(%arg0: i32) -> (i32, i32) {
    %c0_i32 = arith.constant 0 : i32
    %c0_i32_0 = arith.constant 0 : i32
    %c0_i32_1 = arith.constant 0 : i32
    return %c0_i32, %c0_i32_0 : i32, i32
  }
  func.func @transform_2(%arg0: i32) -> (i32, i32) {
    %c0_i32 = arith.constant 0 : i32
    %c0_i32_0 = arith.constant 0 : i32
    %c0_i32_1 = arith.constant 0 : i32
    return %c0_i32, %c0_i32_0 : i32, i32
  }
  func.func @transform_3(%arg0: i32) -> (i32, i32) {
    %c0_i32 = arith.constant 0 : i32
    %c0_i32_0 = arith.constant 0 : i32
    %c0_i32_1 = arith.constant 0 : i32
    return %c0_i32, %c0_i32_0 : i32, i32
  }
  func.func @transform_4(%arg0: i32) -> (i32, i32) {
    %c0_i32 = arith.constant 0 : i32
    %c0_i32_0 = arith.constant 0 : i32
    %c0_i32_1 = arith.constant 0 : i32
    return %c0_i32, %c0_i32_0 : i32, i32
  }
  func.func @transform_5(%arg0: i32) -> (i32, i32) {
    %c0_i32 = arith.constant 0 : i32
    %c0_i32_0 = arith.constant 0 : i32
    %c0_i32_1 = arith.constant 0 : i32
    return %c0_i32, %c0_i32_0 : i32, i32
  }
  func.func @transform_6(%arg0: i32) -> (i32, i32) {
    %c0_i32 = arith.constant 0 : i32
    %c0_i32_0 = arith.constant 0 : i32
    %c0_i32_1 = arith.constant 0 : i32
    return %c0_i32, %c0_i32_0 : i32, i32
  }
  func.func @transform_7(%arg0: i32) -> (i32, i32) {
    %c0_i32 = arith.constant 0 : i32
    %c0_i32_0 = arith.constant 0 : i32
    return %arg0, %c0_i32 : i32, i32
  }
}

</mosaic_0001>

<bundles_post_ra>
// kernel: tpu_custom_call.1
= control target key start
LH: loop header
LB: loop body
LE: loop exit
PB: predicated region body
PF: predicated region fallthrough
CT: control target
= control target key end

     0   :  { %s718_s0 = inlined_call_operand.hbm [shape: f32[8,32], index: 0, kind: input, shape index: {}]   ;;  %s719_s1 = inlined_call_operand.hbm [shape: bf16[32,256], index: 1, kind: input, shape index: {}]   ;;  %s720_s2 = inlined_call_operand.vmem [shape: f32[1,256], index: 2, kind: input, shape index: {}]   ;;  %s721_s3 = inlined_call_operand.hbm [shape: bf16[256,256], index: 3, kind: input, shape index: {}]   ;;  %s722_s4 = inlined_call_operand.vmem [shape: f32[1,256], index: 4, kind: input, shape index: {}]   ;;  %s723_s5 = inlined_call_operand.vmem [shape: f32[1,256], index: 5, kind: input, shape index: {}]   ;;  %s724_s6 = inlined_call_operand.<no memory space> [shape: f32[1,1], index: 6, kind: input, shape index: {}]   ;;  %s725_s7 = inlined_call_operand.vmem [shape: f32[8,1], index: 7, kind: output, shape index: {}]  }
   0x1   :  { %v12_v0 = vstv %s724_s6 }
   0x2   :  { %13 = vst [vmem:[#allocation2] sm:$0x1] %v12_v0 }
   0x3   :  { %14 = vsyncpa [#allocation4], 0 }
   0x4   :  { %15 = vsyncpa [#allocation6], 0  ;;  %s615_s26 = smov [#allocation5]   ;;  %s545_s30 = scalar_lea.hbm %s719_s1, 512 }
   0x5   :  { %s31_s27 = sshll.u32 %s615_s26, 4  ;;  %p546_p0 = scmp.ne.s32.totalorder %s719_s1, %s545_s30  ;;  %s32_s27 = int_to_ptr.vmem [resolvable:$true] %s31_s27 }
   0x6   :  { %p549_p1 = scmp.lt.u32.totalorder %s545_s30, %s719_s1 }
   0x8   :  { %p551_p2 = pnand %p549_p1, %p546_p0 }
   0xa   :  { %554 = shalt.err (!%p551_p2)
}
   0xb   :  { %s555_s6 = scalar_lea.vmem %s32_s27, 512  ;;  %p560_p4 = scmp.lt.s32.totalorder %s32_s27, %s32_s27 }
   0xc   :  { %p556_p3 = scmp.ne.s32.totalorder %s32_s27, %s555_s6  ;;  %p561_p5 = scmp.lt.s32.totalorder %s555_s6, %s555_s6 }
   0xe   :  { %p562_p6 = por %p561_p5, %p560_p4 }
  0x10   :  { %p563_p7 = pnand %p562_p6, %p556_p3 }
  0x12   :  { %566 = shalt.err (!%p563_p7)
}
  0x13   :  { %s616_s12 = smov 128   ;;  %s617_s13 = smov 8  }
  0x14   :  { %37 = dma.hbm_to_vmem [thread:$0]  %s719_s1, 512, %s32_s27, [#allocation6], %s616_s12, %s616_s12, %s617_s13  }
  0x15   :  { %s618_s16 = smov [#allocation3]   ;;  %s619_s18 = smov [#allocation7]  }
  0x16   :  { %s22_s17 = sshll.u32 %s618_s16, 4  ;;  %s45_s19 = sshll.u32 %s619_s18, 4  ;;  %s23_s17 = int_to_ptr.vmem [resolvable:$true] %s22_s17  ;;  %s46_s19 = int_to_ptr.vmem [resolvable:$true] %s45_s19 }
  0x17   :  { %s567_s22 = scalar_lea.hbm %s718_s0, 128 }
  0x18   :  { %p568_p8 = scmp.ne.s32.totalorder %s718_s0, %s567_s22  ;;  %p571_p9 = scmp.lt.u32.totalorder %s567_s22, %s718_s0 }
  0x1a   :  { %p573_p10 = pnand %p571_p9, %p568_p8 }
  0x1c   :  { %576 = shalt.err (!%p573_p10)
}
  0x1d   :  { %s577_s1 = scalar_lea.vmem %s23_s17, 128  ;;  %p582_p12 = scmp.lt.s32.totalorder %s23_s17, %s23_s17 }
  0x1e   :  { %p578_p11 = scmp.ne.s32.totalorder %s23_s17, %s577_s1  ;;  %p583_p13 = scmp.lt.s32.totalorder %s577_s1, %s577_s1 }
  0x20   :  { %p584_p0 = por %p583_p13, %p582_p12 }
  0x22   :  { %p585_p1 = pnand %p584_p0, %p578_p11 }
  0x24   :  { %588 = shalt.err (!%p585_p1)
}
  0x25   :  { %25 = dma.hbm_to_vmem [thread:$0]  %s718_s0, 128, %s23_s17, [#allocation4]  }
  0x26   :  { %s589_s8 = scalar_lea.hbm %s721_s3, 4096 }
  0x27   :  { %p590_p2 = scmp.ne.s32.totalorder %s721_s3, %s589_s8  ;;  %p593_p3 = scmp.lt.u32.totalorder %s589_s8, %s721_s3 }
  0x29   :  { %p595_p4 = pnand %p593_p3, %p590_p2 }
  0x2b   :  { %598 = shalt.err (!%p595_p4)
}
  0x2c   :  { %s599_s14 = scalar_lea.vmem %s46_s19, 4096  ;;  %p604_p6 = scmp.lt.s32.totalorder %s46_s19, %s46_s19 }
  0x2d   :  { %p600_p5 = scmp.ne.s32.totalorder %s46_s19, %s599_s14  ;;  %p605_p7 = scmp.lt.s32.totalorder %s599_s14, %s599_s14 }
  0x2f   :  { %p606_p8 = por %p605_p7, %p604_p6 }
  0x31   :  { %p607_p9 = pnand %p606_p8, %p600_p5 }
  0x33   :  { %610 = shalt.err (!%p607_p9)
}
  0x34   :  { %51 = dma.hbm_to_vmem [thread:$0]  %s721_s3, 4096, %s46_s19, [#allocation6], %s616_s12, %s616_s12, %s617_s13  }
  0x35   :  { %611 = dma.done.wait [#allocation4], 128  }
  0x36   :  { %612 = vsyncadd [#allocation4], 4294967168 }
  0x37   :  { %613 = dma.done.wait [#allocation6], 4608  }
  0x38   :  { %614 = vsyncadd [#allocation6], 4294962688  ;;  %v620_v1 = vmov 0   ;;  %v483_v2 = vld [vmem:[#allocation5 + $0x4] ss:$8 sps:$4 sm:$0xff]   ;;  %v68_v6 = vld [vmem:[#allocation3] sm:$0xff]  ;;  %v76_v40 = vlaneseq }
  0x39   :  { %142 = vmatprep.mubr.bf16.mxu0 %v620_v1  ;;  %v485_v3 = vld [vmem:[#allocation5] ss:$8 sps:$4 sm:$0xff]   ;;  %110 = vmatprep.subr.bf16.mxu0 %v483_v2  ;;  %v486_v4 = vld [vmem:[#allocation5 + $0x14] ss:$8 sps:$4 sm:$0xff]   ;;  %v488_v5 = vld [vmem:[#allocation5 + $0x10] ss:$8 sps:$4 sm:$0xff]   ;;  %v69_v10 = vpack.c.bf16 %v68_v6, %v68_v6 }
  0x3a   :  { %111 = vmatpush1.bf16.msra.mxu0 %v485_v3  ;;  %v489_v7 = vld [vmem:[#allocation7 + $0x4] ss:$8 sps:$4 sm:$0xff]   ;;  %v491_v8 = vld [vmem:[#allocation7] ss:$8 sps:$4 sm:$0xff]   ;;  %v492_v9 = vld [vmem:[#allocation7 + $0x14] ss:$8 sps:$4 sm:$0xff]  }
  0x3b   :  { %112 = vmatprep.subr.bf16.mxu0 %v486_v4  ;;  %359 = vmatprep.subr.bf16.mxu1 %v489_v7  ;;  %v494_v11 = vld [vmem:[#allocation7 + $0x10] ss:$8 sps:$4 sm:$0xff]   ;;  %vm106_vm0 = vcmask 261120   ;;  %v495_v12 = vld [vmem:[#allocation7 + $0x24] ss:$8 sps:$4 sm:$0xff]   ;;  %v77_v41 = vshrl.u32 %v76_v40, 7 }
  0x3c   :  { %360 = vmatpush1.bf16.msra.mxu1 %v491_v8  ;;  %v497_v13 = vld [vmem:[#allocation7 + $0x20] ss:$8 sps:$4 sm:$0xff]   ;;  %v498_v14 = vld [vmem:[#allocation7 + $0x34] ss:$8 sps:$4 sm:$0xff]   ;;  %v500_v15 = vld [vmem:[#allocation7 + $0x30] ss:$8 sps:$4 sm:$0xff]  }
  0x3d   :  { %361 = vmatprep.subr.bf16.mxu1 %v492_v9  ;;  %v501_v16 = vld [vmem:[#allocation7 + $0x44] ss:$8 sps:$4 sm:$0xff]   ;;  %v503_v17 = vld [vmem:[#allocation7 + $0x40] ss:$8 sps:$4 sm:$0xff]   ;;  %v504_v18 = vld [vmem:[#allocation7 + $0x54] ss:$8 sps:$4 sm:$0xff]  }
  0x3e   :  { %113 = vmatpush1.bf16.msra.mxu0 %v488_v5  ;;  %v506_v19 = vld [vmem:[#allocation7 + $0x50] ss:$8 sps:$4 sm:$0xff]   ;;  %v507_v20 = vld [vmem:[#allocation7 + $0x64] ss:$8 sps:$4 sm:$0xff]   ;;  %v509_v21 = vld [vmem:[#allocation7 + $0x60] ss:$8 sps:$4 sm:$0xff]  }
  0x3f   :  { %v510_v22 = vld [vmem:[#allocation7 + $0x74] ss:$8 sps:$4 sm:$0xff]   ;;  %v512_v23 = vld [vmem:[#allocation7 + $0x70] ss:$8 sps:$4 sm:$0xff]   ;;  %v513_v24 = vld [vmem:[#allocation7 + $0x84] ss:$8 sps:$4 sm:$0xff]  }
  0x40   :  { %362 = vmatpush1.bf16.msra.mxu1 %v494_v11  ;;  %v515_v25 = vld [vmem:[#allocation7 + $0x80] ss:$8 sps:$4 sm:$0xff]   ;;  %v516_v26 = vld [vmem:[#allocation7 + $0x94] ss:$8 sps:$4 sm:$0xff]   ;;  %v518_v27 = vld [vmem:[#allocation7 + $0x90] ss:$8 sps:$4 sm:$0xff]  }
  0x41   :  { %443 = vmatmul.mubr.msk.bf16.vlgmr.msra.gmra.mrb[0].mxu0 %vm106_vm0, %v69_v10  ;;  %363 = vmatprep.subr.bf16.mxu1 %v495_v12  ;;  %v519_v28 = vld [vmem:[#allocation7 + $0xa4] ss:$8 sps:$4 sm:$0xff]   ;;  %v521_v29 = vld [vmem:[#allocation7 + $0xa0] ss:$8 sps:$4 sm:$0xff]   ;;  %v522_v30 = vld [vmem:[#allocation7 + $0xb4] ss:$8 sps:$4 sm:$0xff]  }
  0x42   :  { %v524_v31 = vld [vmem:[#allocation7 + $0xb0] ss:$8 sps:$4 sm:$0xff]   ;;  %v525_v32 = vld [vmem:[#allocation7 + $0xc4] ss:$8 sps:$4 sm:$0xff]   ;;  %v527_v33 = vld [vmem:[#allocation7 + $0xc0] ss:$8 sps:$4 sm:$0xff]  }
  0x43   :  { %v528_v34 = vld [vmem:[#allocation7 + $0xd4] ss:$8 sps:$4 sm:$0xff]   ;;  %v530_v35 = vld [vmem:[#allocation7 + $0xd0] ss:$8 sps:$4 sm:$0xff]   ;;  %v531_v36 = vld [vmem:[#allocation7 + $0xe4] ss:$8 sps:$4 sm:$0xff]  }
  0x44   :  { %364 = vmatpush1.bf16.msra.mxu1 %v497_v13  ;;  %v533_v37 = vld [vmem:[#allocation7 + $0xe0] ss:$8 sps:$4 sm:$0xff]   ;;  %v534_v38 = vld [vmem:[#allocation7 + $0xf4] ss:$8 sps:$4 sm:$0xff]   ;;  %v536_v39 = vld [vmem:[#allocation7 + $0xf0] ss:$8 sps:$4 sm:$0xff]  }
  0x45   :  { %365 = vmatprep.subr.bf16.mxu1 %v498_v14  ;;  %v78_v42 = vsub.s32 0, %v77_v41  ;;  %v74_v43 = vld [vmem:[%s720_s2] sm:$0x3]  ;;  %v82_v44 = vsub.s32 1, %v77_v41  ;;  %vm431_vm1 = vcmask 7168  }
  0x46   :  { %v187_v57 = vld [vmem:[%s722_s4] sm:$0x3] }
  0x47   :  { %v79_v45 = vrot.slane %v74_v43, %v78_v42  ;;  %v83_v46 = vrot.slane %v74_v43, %v82_v44  ;;  %v192_v58 = vrot.slane %v187_v57, %v78_v42  ;;  %v196_v59 = vrot.slane %v187_v57, %v82_v44  ;;  %v406_v4 = vld [vmem:[%s723_s5] sm:$0x3] }
  0x48   :  { %366 = vmatpush1.bf16.msra.mxu1 %v500_v15  ;;  %v411_v5 = vrot.slane %v406_v4, %v78_v42  ;;  %v415_v7 = vrot.slane %v406_v4, %v82_v44  ;;  %v476_v14 = vld [vmem:[#allocation2] ss:$0 sm:$0xff] }
  0x49   :  { %367 = vmatprep.subr.bf16.mxu1 %v501_v16 }
  0x4c   :  { %368 = vmatpush1.bf16.msra.mxu1 %v503_v17 }
  0x4d   :  { %369 = vmatprep.subr.bf16.mxu1 %v504_v18 }
  0x50   :  { %370 = vmatpush1.bf16.msra.mxu1 %v506_v19 }
  0x51   :  { %371 = vmatprep.subr.bf16.mxu1 %v507_v20 }
  0x54   :  { %372 = vmatpush1.bf16.msra.mxu1 %v509_v21 }
  0x55   :  { %373 = vmatprep.subr.bf16.mxu1 %v510_v22 }
  0x58   :  { %374 = vmatpush1.bf16.msra.mxu1 %v512_v23 }
  0x59   :  { %375 = vmatprep.subr.bf16.mxu1 %v513_v24 }
  0x5c   :  { %376 = vmatpush1.bf16.msra.mxu1 %v515_v25 }
  0x5d   :  { %377 = vmatprep.subr.bf16.mxu1 %v516_v26 }
  0x60   :  { %378 = vmatpush1.bf16.msra.mxu1 %v518_v27 }
  0x61   :  { %379 = vmatprep.subr.bf16.mxu1 %v519_v28 }
  0x64   :  { %380 = vmatpush1.bf16.msra.mxu1 %v521_v29 }
  0x65   :  { %381 = vmatprep.subr.bf16.mxu1 %v522_v30 }
  0x68   :  { %382 = vmatpush1.bf16.msra.mxu1 %v524_v31 }
  0x69   :  { %383 = vmatprep.subr.bf16.mxu1 %v525_v32 }
  0x6c   :  { %384 = vmatpush1.bf16.msra.mxu1 %v527_v33 }
  0x6d   :  { %385 = vmatprep.subr.bf16.mxu1 %v528_v34 }
  0x70   :  { %386 = vmatpush1.bf16.msra.mxu1 %v530_v35 }
  0x71   :  { %387 = vmatprep.subr.bf16.mxu1 %v531_v36 }
  0x74   :  { %388 = vmatpush1.bf16.msra.mxu1 %v533_v37 }
  0x75   :  { %389 = vmatprep.subr.bf16.mxu1 %v534_v38 }
  0x78   :  { %390 = vmatpush1.bf16.msra.mxu1 %v536_v39 }
 0x114   :  { %v144_v47 = vpop.f32.mrb[0].mxu0 }
 0x115   :  { %v145_v48 = vadd.f32 %v144_v47, %v79_v45  ;;  %v146_v49 = vpop.f32.mrb[1].mxu0 }
 0x116   :  { %v147_v50 = vadd.f32 %v146_v49, %v83_v46  ;;  %v148_v51 = vpop.f32.mrb[2].mxu0 }
 0x117   :  { %v151_v52 = vpack.c.bf16 %v145_v48, %v145_v48  ;;  %v149_v53 = vpop.f32.mrb[3].mxu0 }
 0x118   :  { %v152_v54 = vpack.c.bf16 %v147_v50, %v147_v50 }
 0x11a   :  { %537 = vtanh.bf16 %v152_v54 }
 0x11b   :  { %539 = vtanh.bf16 %v151_v52 }
 0x125   :  { %v538_v55 = vpop.eup %537 }
 0x126   :  { %v540_v56 = vpop.eup %539  ;;  %391 = vmatprep.mubr.bf16.mxu1 %v538_v55 }
 0x127   :  { %392 = vmatmul.mubr.bf16.vlgmr.msra.gmra.mrb[0].mxu1 %v540_v56 }
 0x1fa   :  { %v393_v60 = vpop.f32.mrb[0].mxu1 }
 0x1fb   :  { %v394_v61 = vadd.f32 %v393_v60, %v192_v58  ;;  %v395_v62 = vpop.f32.mrb[1].mxu1 }
 0x1fc   :  { %v396_v63 = vadd.f32 %v395_v62, %v196_v59  ;;  %v397_v0 = vpop.f32.mrb[2].mxu1 }
 0x1fd   :  { %v400_v1 = vpack.c.bf16 %v394_v61, %v394_v61  ;;  %v398_v2 = vpop.f32.mrb[3].mxu1 }
 0x1fe   :  { %v401_v3 = vpack.c.bf16 %v396_v63, %v396_v63 }
 0x1ff   :  { %541 = vtanh.bf16 %v400_v1 }
 0x200   :  { %543 = vtanh.bf16 %v401_v3 }
 0x20a   :  { %v542_v6 = vpop.eup %541 }
 0x20b   :  { %v544_v8 = vpop.eup %543  ;;  %v404_v9 = vunpack.c.l.bf16 %v542_v6 }
 0x20c   :  { %v405_v10 = vunpack.c.l.bf16 %v544_v8 }
 0x20d   :  { %v418_v11 = vmul.f32 %v411_v5, %v404_v9 }
 0x20e   :  { %v419_v12 = vmul.f32 %v415_v7, %v405_v10 }
 0x210   :  { %v420_v13 = vadd.f32 %v419_v12, %v418_v11 }
 0x212   :  { %421 = vadd.xlane.f32.xlu0 %v420_v13 }
 0x29f   :  { %v422_v15 = vpop.xlane.xlu0 %421 }
 0x2a0   :  { %v430_v16 = vadd.f32 %v476_v14, %v422_v15 }
 0x2a2   :  { %432 = vst.msk [vmem:[%s725_s7] sm:$0xff] %vm431_vm1, %v430_v16 }
 0x2a3   :  { %437 = vsyncpa [#allocation4], 1 }
 0x2a4   :  { %438 = vsyncpa [#allocation6], 1 }

</bundles_post_ra>
